<compile_context>
chip_gen: v7x
topology: tpu7x:2x2x1
jax: 0.10.0
libtpu: 0.0.40
codegen_flags: <defaults>
</compile_context>

<pallas_src>
import functools

import jax
import jax.numpy as jnp
from jax.experimental import pallas as pl
from jax.experimental.pallas import tpu as pltpu


# ------------------------------ Pallas kernel -------------------------------

def _mdcl_kernel(x_ref, wa_ref, ba_ref, wl_ref, bl_ref, out_ref, ent_ref, *,
                 num_domains, out_features, fused):
    """Fused MDCL forward for one batch tile.

    x_ref  : (tm, K)        f32   input activations (cast to bf16 in-body)
    wa_ref : (K, D)         bf16  aux classifier weight
    ba_ref : (1, D)         f32   aux classifier bias
    wl_ref : (K, D*N) bf16  [fused]   or (D, K, N) bf16 [fallback]
    bl_ref : (1, D*N) f32   [fused]   or (D, 1, N) f32  [fallback]
    out_ref: (tm, N)        f32   combined output (lane-dense)
    ent_ref: (1, 1)         f32   per-tile entropy SUM (mean finished outside)
    """
    x = x_ref[...].astype(jnp.bfloat16)                          # in-kernel cast

    # --- aux classifier + numerically stable softmax (f32 epilogue) ---------
    logits = jnp.dot(x, wa_ref[...], preferred_element_type=jnp.float32)
    logits = logits + ba_ref[...]                                # (tm, D)
    m = jnp.max(logits, axis=-1, keepdims=True)
    z = logits - m
    e = jnp.exp(z)
    s = jnp.sum(e, axis=-1, keepdims=True)
    inv_s = pl.reciprocal(s, approx=True)                        # EUP slot
    p = e * inv_s                                                # (tm, D)

    # entropy per row:  -sum p*logp  with  logp = z - log(s),  sum(p) = 1
    #   =>  H = log(s) - sum(p * z)
    row_ent = jnp.log(s) - jnp.sum(p * z, axis=-1, keepdims=True)  # (tm, 1)
    ent_ref[...] = jnp.sum(row_ent, axis=0, keepdims=True)         # (1, 1) tile sum

    # --- per-domain linears + softmax-weighted combine -----------------------
    D, N = num_domains, out_features
    acc = jnp.zeros(out_ref.shape, jnp.float32)
    if fused:
        # one wide matmul over all domains; combine via lane-aligned slices
        y = jnp.dot(x, wl_ref[...], preferred_element_type=jnp.float32)
        y = y + bl_ref[...]                                      # (tm, D*N)
        for d in range(D):
            acc = acc + p[:, d:d + 1] * y[:, d * N:(d + 1) * N]
    else:
        for d in range(D):
            yd = jnp.dot(x, wl_ref[d], preferred_element_type=jnp.float32)
            yd = yd + bl_ref[d]                                  # (tm, N)
            acc = acc + p[:, d:d + 1] * yd
    out_ref[...] = acc


# ------------------------------ spec helpers ---------------------------------

def _resident_spec(block_shape, index_map):
    """Constant-index (weight) block: request single buffering when supported.

    Falls back to a plain BlockSpec if this jax version does not expose
    pipeline_mode / pl.Buffered.
    """
    try:
        return pl.BlockSpec(block_shape, index_map,
                            pipeline_mode=pl.Buffered(1))
    except Exception:
        return pl.BlockSpec(block_shape, index_map)


def _num_tensorcores():
    """Best-effort TensorCore count (2 on v7x, 1 on v5e/v6e); default 1."""
    try:
        return max(1, int(getattr(jax.devices()[0], "num_cores", 1)))
    except Exception:
        return 1


def _pick_tm(batch, k, n, resident_bytes, budget_bytes, num_cores):
    """Largest 8-aligned batch tile whose per-step buffers fit the VMEM budget.

    Only forces multiple grid steps when the chip has >1 TensorCore (splitting
    a small batch on a 1-TC chip is pure per-step overhead).
    """
    candidates = [t for t in (1024, 512, 256, 128, 64, 32, 16, 8)
                  if t <= batch and batch % t == 0]
    if not candidates:
        return batch  # single full-extent block is always legal
    tm = None
    for t in candidates:  # descending
        per_step = 2 * t * k * 4 + 2 * t * n * 4  # dbl-buffered x(f32) + out(f32)
        if resident_bytes + per_step <= budget_bytes:
            tm = t
            break
    if tm is None:
        tm = candidates[-1]
    if num_cores > 1:
        for t in candidates:  # largest t <= tm that still yields >= num_cores steps
            if t <= tm and batch // t >= num_cores:
                tm = t
                break
    return tm


# ------------------------------ forward wrapper -------------------------------

def mdcl_forward(params, x):
    """MDCL.forward: returns (combine_outputs, cluster_loss, aux_entropy_loss)."""
    B, K = x.shape
    wa = params["aux_w"]        # (K, D)    bf16
    ba = params["aux_b"]        # (1, D)    f32
    wl = params["layers_w"]     # (K, D, N) bf16
    bl = params["layers_b"]     # (D, N)    f32
    K2, D, N = wl.shape
    assert K2 == K

    # Fused single-matmul path requires 128-lane-aligned per-domain slices.
    fused = (N % 128 == 0)
    if fused:
        wl_arg = wl.reshape(K, D * N)                    # free reshape (layout kept)
        bl_arg = bl.reshape(1, D * N)
        wl_spec = _resident_spec((K, D * N), lambda i: (0, 0))
        bl_spec = _resident_spec((1, D * N), lambda i: (0, 0))
    else:
        wl_arg = jnp.transpose(wl, (1, 0, 2))            # (D, K, N)
        bl_arg = bl.reshape(D, 1, N)
        wl_spec = _resident_spec((D, K, N), lambda i: (0, 0, 0))
        bl_spec = _resident_spec((D, 1, N), lambda i: (0, 0, 0))

    weight_bytes = K * D * N * 2 + D * N * 4 + K * D * 2 + D * 4  # wl + bl + wa + ba

    num_cores = _num_tensorcores()
    budget = 48 << 20                      # conservative: fits v7x 64 MiB physical
    tm = _pick_tm(B, K, N, weight_bytes, budget, num_cores)
    num_tiles = B // tm
    grid = (num_tiles,)

    # Explicit VMEM limit with headroom (assume worst-case 2 weight buffers if
    # Buffered(1) was unavailable, plus the (tm, D*N) f32 intermediate).
    vmem_need = (2 * weight_bytes
                 + 2 * tm * K * 4 + 2 * tm * N * 4
                 + tm * D * N * 4)
    vmem_limit = min(int(vmem_need * 1.5) + (8 << 20), 96 << 20)

    cost = pl.CostEstimate(
        flops=2 * B * K * (D * N + D) + 4 * B * D * N,
        transcendentals=B * (D + 2),
        bytes_accessed=B * K * 4 + weight_bytes + B * N * 4 + num_tiles * 4,
    )

    kernel = functools.partial(_mdcl_kernel, num_domains=D, out_features=N,
                               fused=fused)

    out, ent_tiles = pl.pallas_call(
        kernel,
        out_shape=(jax.ShapeDtypeStruct((B, N), jnp.float32),
                   jax.ShapeDtypeStruct((num_tiles, 1), jnp.float32)),
        grid_spec=pltpu.PrefetchScalarGridSpec(
            num_scalar_prefetch=0,
            grid=grid,
            in_specs=[
                pl.BlockSpec((tm, K), lambda i: (i, 0)),        # x tile (f32)
                _resident_spec((K, D), lambda i: (0, 0)),       # aux W (resident)
                _resident_spec((1, D), lambda i: (0, 0)),       # aux b (resident)
                wl_spec,                                        # layer Ws (resident)
                bl_spec,                                        # layer bs (resident)
            ],
            out_specs=[
                pl.BlockSpec((tm, N), lambda i: (i, 0)),        # combine (lane-dense)
                pl.BlockSpec((1, 1), lambda i: (i, 0)),         # per-tile entropy sum
            ],
        ),
        compiler_params=pltpu.CompilerParams(
            dimension_semantics=("parallel",),
            vmem_limit_bytes=vmem_limit),
        cost_estimate=cost,
    )(x, wa, ba, wl_arg, bl_arg)

    # TODO(synk): EntropyLoss definition not included in the spec; using the
    # standard -sum(softmax * log_softmax) per row, averaged over the batch.
    aux_entropy_loss = jnp.sum(ent_tiles) / B

    # TODO(synk): ClusterLoss1 definition not included in the spec; returning
    # 0.0 (same value the module returns on its latent_domain_num == 1 path).
    cluster_loss = jnp.float32(0.0)

    return out, cluster_loss, aux_entropy_loss


# ----------------------------- parameter init --------------------------------

def init_params(key, in_features, out_features, latent_domain_num):
    """Synthetic, PyTorch-Linear-style uniform init. Weights stored (in, dom, out)."""
    ka_w, ka_b, kl_w, kl_b = jax.random.split(key, 4)
    bound = 1.0 / (in_features ** 0.5)

    aux_w = jax.random.uniform(ka_w, (in_features, latent_domain_num),
                               jnp.float32, -bound, bound)
    aux_b = jax.random.uniform(ka_b, (1, latent_domain_num),
                               jnp.float32, -bound, bound)
    layers_w = jax.random.uniform(
        kl_w, (in_features, latent_domain_num, out_features),
        jnp.float32, -bound, bound)
    layers_b = jax.random.uniform(kl_b, (latent_domain_num, out_features),
                                  jnp.float32, -bound, bound)
    return {
        "aux_w": aux_w.astype(jnp.bfloat16),
        "aux_b": aux_b,                                  # biases stay f32
        "layers_w": layers_w.astype(jnp.bfloat16),
        "layers_b": layers_b,
    }


# ----------------------------- pure-JAX reference ----------------------------

def mdcl_reference(params, x):
    xb = x.astype(jnp.bfloat16).astype(jnp.float32)
    wa = params["aux_w"].astype(jnp.float32)
    wl = params["layers_w"].astype(jnp.float32)          # (K, D, N)
    logits = xb @ wa + params["aux_b"]
    p = jax.nn.softmax(logits, axis=1)
    logp = jax.nn.log_softmax(logits, axis=1)
    ent = jnp.mean(-jnp.sum(p * logp, axis=1))
    outs = jnp.einsum("bk,kdn->bdn", xb, wl) + params["layers_b"][None]  # (B,D,N)
    combine = jnp.einsum("bd,bdn->bn", p, outs)
    return combine, jnp.float32(0.0), ent


# --------------------------------- main ---------------------------------------

if __name__ == "__main__":
    key = jax.random.PRNGKey(0)
    pkey, xkey = jax.random.split(key)

    B, IN_FEATURES, OUT_FEATURES, LATENT_DOMAINS = 32, 256, 128, 2
    params = init_params(pkey, IN_FEATURES, OUT_FEATURES, LATENT_DOMAINS)
    x = jax.random.normal(xkey, (B, IN_FEATURES), jnp.float32)

    fwd = jax.jit(mdcl_forward)
    out, cluster_loss, entropy_loss = jax.block_until_ready(fwd(params, x))

    assert out.shape == (B, OUT_FEATURES), out.shape
    assert bool(jnp.all(jnp.isfinite(out)))
    assert bool(jnp.isfinite(entropy_loss))

    # sanity check against a pure-JAX reference (bf16 operands, f32 accum)
    ref_out, _, ref_ent = mdcl_reference(params, x)
    assert bool(jnp.allclose(out, ref_out, rtol=2e-2, atol=2e-2)), (
        float(jnp.max(jnp.abs(out - ref_out))))
    assert bool(jnp.allclose(entropy_loss, ref_ent, rtol=2e-2, atol=2e-2))

    print("KERNEL_OK")
</pallas_src>

<mosaic_0001>
module attributes {stable_mosaic.version = 11 : i64} {
  func.func @_mdcl_kernel(%arg0: i32, %arg1: memref<32x256xf32, #tpu.memory_space<vmem>>, %arg2: memref<256x2xbf16, #tpu.memory_space<vmem>>, %arg3: memref<1x2xf32, #tpu.memory_space<vmem>>, %arg4: memref<256x256xbf16, #tpu.memory_space<vmem>>, %arg5: memref<1x256xf32, #tpu.memory_space<vmem>>, %arg6: memref<32x128xf32, #tpu.memory_space<vmem>>, %arg7: memref<1x1xf32, #tpu.memory_space<vmem>>) attributes {dimension_semantics = [#tpu.dimension_semantics<parallel>], iteration_bounds = array<i64: 1>, scalar_prefetch = 0 : i64, scratch_operands = 0 : i64, tpu.core_type = #tpu.core_type<tc>, window_params = [{transform_indices = @transform_0, window_bounds = array<i64: 32, 256>}, {pipeline_mode = #tpu.pipeline_mode<synchronous>, transform_indices = @transform_1, window_bounds = array<i64: 256, 2>}, {pipeline_mode = #tpu.pipeline_mode<synchronous>, transform_indices = @transform_2, window_bounds = array<i64: 1, 2>}, {pipeline_mode = #tpu.pipeline_mode<synchronous>, transform_indices = @transform_3, window_bounds = array<i64: 256, 256>}, {pipeline_mode = #tpu.pipeline_mode<synchronous>, transform_indices = @transform_4, window_bounds = array<i64: 1, 256>}, {transform_indices = @transform_5, window_bounds = array<i64: 32, 128>}, {transform_indices = @transform_6, window_bounds = array<i64: 1, 1>}]} {
    %c0 = arith.constant 0 : index
    %c0_0 = arith.constant 0 : index
    %0 = vector.load %arg1[%c0, %c0_0] : memref<32x256xf32, #tpu.memory_space<vmem>>, vector<32x256xf32>
    %1 = arith.truncf %0 : vector<32x256xf32> to vector<32x256xbf16>
    %c0_1 = arith.constant 0 : index
    %c0_2 = arith.constant 0 : index
    %2 = vector.load %arg2[%c0_1, %c0_2] : memref<256x2xbf16, #tpu.memory_space<vmem>>, vector<256x2xbf16>
    %cst = arith.constant dense<0.000000e+00> : vector<32x2xf32>
    %3 = tpu.matmul %1, %2, %cst {dimension_numbers = #tpu.dot_dimension_numbers<[1], [0], [0], [1], [0, 0, 1, 1], [], []>} : vector<32x256xbf16>, vector<256x2xbf16>, vector<32x2xf32> -> vector<32x2xf32>
    %c0_3 = arith.constant 0 : index
    %c0_4 = arith.constant 0 : index
    %4 = vector.load %arg3[%c0_3, %c0_4] : memref<1x2xf32, #tpu.memory_space<vmem>>, vector<1x2xf32>
    %5 = vector.broadcast %4 : vector<1x2xf32> to vector<32x2xf32>
    %6 = arith.addf %3, %5 : vector<32x2xf32>
    %cst_5 = arith.constant dense<0xFF800000> : vector<32xf32>
    %7 = vector.multi_reduction <maximumf>, %6, %cst_5 [1] : vector<32x2xf32> to vector<32xf32>
    %8 = vector.shape_cast %7 : vector<32xf32> to vector<32x1xf32>
    %9 = vector.broadcast %8 : vector<32x1xf32> to vector<32x2xf32>
    %10 = arith.subf %6, %9 : vector<32x2xf32>
    %11 = math.exp %10 : vector<32x2xf32>
    %cst_6 = arith.constant dense<0.000000e+00> : vector<32xf32>
    %12 = vector.multi_reduction <add>, %11, %cst_6 [1] : vector<32x2xf32> to vector<32xf32>
    %13 = vector.shape_cast %12 : vector<32xf32> to vector<32x1xf32>
    %14 = tpu.reciprocal %13 {approx = true} : vector<32x1xf32> -> vector<32x1xf32>
    %15 = vector.broadcast %14 : vector<32x1xf32> to vector<32x2xf32>
    %16 = arith.mulf %11, %15 : vector<32x2xf32>
    %17 = math.log %13 : vector<32x1xf32>
    %18 = arith.mulf %16, %10 : vector<32x2xf32>
    %cst_7 = arith.constant dense<0.000000e+00> : vector<32xf32>
    %19 = vector.multi_reduction <add>, %18, %cst_7 [1] : vector<32x2xf32> to vector<32xf32>
    %20 = vector.shape_cast %19 : vector<32xf32> to vector<32x1xf32>
    %21 = arith.subf %17, %20 : vector<32x1xf32>
    %cst_8 = arith.constant dense<0.000000e+00> : vector<1xf32>
    %22 = vector.multi_reduction <add>, %21, %cst_8 [0] : vector<32x1xf32> to vector<1xf32>
    %23 = vector.shape_cast %22 : vector<1xf32> to vector<1x1xf32>
    %c0_9 = arith.constant 0 : index
    %c0_10 = arith.constant 0 : index
    %24 = vector.load %arg7[%c0_9, %c0_10] : memref<1x1xf32, #tpu.memory_space<vmem>>, vector<1x1xf32>
    tpu.vector_store %arg7[%c0_9, %c0_10], %23 {strides = array<i32>} : memref<1x1xf32, #tpu.memory_space<vmem>>, vector<1x1xf32>,
    %cst_11 = arith.constant 0.000000e+00 : f32
    %25 = vector.broadcast %cst_11 : f32 to vector<32x128xf32>
    %c0_12 = arith.constant 0 : index
    %c0_13 = arith.constant 0 : index
    %26 = vector.load %arg4[%c0_12, %c0_13] : memref<256x256xbf16, #tpu.memory_space<vmem>>, vector<256x256xbf16>
    %cst_14 = arith.constant dense<0.000000e+00> : vector<32x256xf32>
    %27 = tpu.matmul %1, %26, %cst_14 {dimension_numbers = #tpu.dot_dimension_numbers<[1], [0], [0], [1], [0, 0, 1, 1], [], []>} : vector<32x256xbf16>, vector<256x256xbf16>, vector<32x256xf32> -> vector<32x256xf32>
    %c0_15 = arith.constant 0 : index
    %c0_16 = arith.constant 0 : index
    %28 = vector.load %arg5[%c0_15, %c0_16] : memref<1x256xf32, #tpu.memory_space<vmem>>, vector<1x256xf32>
    %29 = vector.broadcast %28 : vector<1x256xf32> to vector<32x256xf32>
    %30 = arith.addf %27, %29 : vector<32x256xf32>
    %31 = vector.extract_strided_slice %16 {offsets = [0, 0], sizes = [32, 1], strides = [1, 1]} : vector<32x2xf32> to vector<32x1xf32>
    %32 = vector.extract_strided_slice %30 {offsets = [0, 0], sizes = [32, 128], strides = [1, 1]} : vector<32x256xf32> to vector<32x128xf32>
    %33 = vector.broadcast %31 : vector<32x1xf32> to vector<32x128xf32>
    %34 = arith.mulf %33, %32 : vector<32x128xf32>
    %35 = arith.addf %25, %34 : vector<32x128xf32>
    %36 = vector.extract_strided_slice %16 {offsets = [0, 1], sizes = [32, 1], strides = [1, 1]} : vector<32x2xf32> to vector<32x1xf32>
    %37 = vector.extract_strided_slice %30 {offsets = [0, 128], sizes = [32, 128], strides = [1, 1]} : vector<32x256xf32> to vector<32x128xf32>
    %38 = vector.broadcast %36 : vector<32x1xf32> to vector<32x128xf32>
    %39 = arith.mulf %38, %37 : vector<32x128xf32>
    %40 = arith.addf %35, %39 : vector<32x128xf32>
    %c0_17 = arith.constant 0 : index
    %c0_18 = arith.constant 0 : index
    %41 = vector.load %arg6[%c0_17, %c0_18] : memref<32x128xf32, #tpu.memory_space<vmem>>, vector<32x128xf32>
    tpu.vector_store %arg6[%c0_17, %c0_18], %40 {strides = array<i32>} : memref<32x128xf32, #tpu.memory_space<vmem>>, vector<32x128xf32>,
    return
  }
  func.func @transform_0(%arg0: i32) -> (i32, i32) {
    %c0_i32 = arith.constant 0 : i32
    %c0_i32_0 = arith.constant 0 : i32
    return %arg0, %c0_i32 : i32, i32
  }
  func.func @transform_1(%arg0: i32) -> (i32, i32) {
    %c0_i32 = arith.constant 0 : i32
    %c0_i32_0 = arith.constant 0 : i32
    %c0_i32_1 = arith.constant 0 : i32
    return %c0_i32, %c0_i32_0 : i32, i32
  }
  func.func @transform_2(%arg0: i32) -> (i32, i32) {
    %c0_i32 = arith.constant 0 : i32
    %c0_i32_0 = arith.constant 0 : i32
    %c0_i32_1 = arith.constant 0 : i32
    return %c0_i32, %c0_i32_0 : i32, i32
  }
  func.func @transform_3(%arg0: i32) -> (i32, i32) {
    %c0_i32 = arith.constant 0 : i32
    %c0_i32_0 = arith.constant 0 : i32
    %c0_i32_1 = arith.constant 0 : i32
    return %c0_i32, %c0_i32_0 : i32, i32
  }
  func.func @transform_4(%arg0: i32) -> (i32, i32) {
    %c0_i32 = arith.constant 0 : i32
    %c0_i32_0 = arith.constant 0 : i32
    %c0_i32_1 = arith.constant 0 : i32
    return %c0_i32, %c0_i32_0 : i32, i32
  }
  func.func @transform_5(%arg0: i32) -> (i32, i32) {
    %c0_i32 = arith.constant 0 : i32
    %c0_i32_0 = arith.constant 0 : i32
    return %arg0, %c0_i32 : i32, i32
  }
  func.func @transform_6(%arg0: i32) -> (i32, i32) {
    %c0_i32 = arith.constant 0 : i32
    %c0_i32_0 = arith.constant 0 : i32
    return %arg0, %c0_i32 : i32, i32
  }
}

</mosaic_0001>

<bundles_post_ra>
// kernel: mdcl_forward.1
= control target key start
LH: loop header
LB: loop body
LE: loop exit
PB: predicated region body
PF: predicated region fallthrough
CT: control target
= control target key end

     0   :  { %12 = vsyncpa [#allocation3], 0  ;;  %s1158_s0 = inlined_call_operand.vmem [shape: f32[32,256], index: 0, kind: input, shape index: {}]   ;;  %s1159_s1 = inlined_call_operand.vmem [shape: bf16[256,2], index: 1, kind: input, shape index: {}]   ;;  %s1160_s2 = inlined_call_operand.vmem [shape: f32[1,2], index: 2, kind: input, shape index: {}]   ;;  %s1161_s3 = inlined_call_operand.vmem [shape: bf16[256,256], index: 3, kind: input, shape index: {}]   ;;  %s1162_s4 = inlined_call_operand.vmem [shape: f32[1,256], index: 4, kind: input, shape index: {}]   ;;  %s1163_s5 = inlined_call_operand.hbm [shape: f32[32,128], index: 5, kind: output, shape index: {0}]   ;;  %s1164_s6 = inlined_call_operand.hbm [shape: f32[1,1], index: 6, kind: output, shape index: {1}]  }
   0x1   :  { %v735_v0 = vld [vmem:[%s1159_s1 + $0x40] sm:$0xff]   ;;  %v737_v2 = vld [vmem:[%s1159_s1 + $0x48] sm:$0xff]   ;;  %v739_v4 = vld [vmem:[%s1159_s1 + $0x50] sm:$0xff]  }
   0x2   :  { %v736_v1 = vld [vmem:[%s1159_s1] sm:$0xff]   ;;  %697 = vmatprep.subr.bf16.mxu0 %v735_v0  ;;  %v738_v3 = vld [vmem:[%s1159_s1 + $0x8] sm:$0xff]   ;;  %v740_v5 = vld [vmem:[%s1159_s1 + $0x10] sm:$0xff]  }
   0x3   :  { %698 = vmatpush3.bf16.msra.mxu0 %v736_v1  ;;  %v741_v6 = vld [vmem:[%s1159_s1 + $0x58] sm:$0xff]   ;;  %v743_v8 = vld [vmem:[%s1159_s1 + $0x60] sm:$0xff]   ;;  %v745_v10 = vld [vmem:[%s1159_s1 + $0x68] sm:$0xff]  }
   0x4   :  { %699 = vmatprep.subr.bf16.mxu0 %v737_v2  ;;  %v742_v7 = vld [vmem:[%s1159_s1 + $0x18] sm:$0xff]   ;;  %v744_v9 = vld [vmem:[%s1159_s1 + $0x20] sm:$0xff]   ;;  %v26_v11 = vld [vmem:[%s1158_s0 + $0x8] sm:$0xff] }
   0x5   :  { %v28_v12 = vld [vmem:[%s1158_s0 + $0x18] sm:$0xff]  ;;  %v746_v14 = vld [vmem:[%s1159_s1 + $0x28] sm:$0xff]   ;;  %v747_v15 = vld [vmem:[%s1159_s1 + $0x70] sm:$0xff]  }
   0x6   :  { %v34_v13 = vpack.c.bf16 %v28_v12, %v26_v11  ;;  %v748_v16 = vld [vmem:[%s1159_s1 + $0x30] sm:$0xff]   ;;  %v749_v17 = vld [vmem:[%s1159_s1 + $0x78] sm:$0xff]   ;;  %v25_v19 = vld [vmem:[%s1158_s0] sm:$0xff] }
   0x7   :  { %700 = vmatpush3.bf16.msra.mxu0 %v738_v3  ;;  %v750_v18 = vld [vmem:[%s1159_s1 + $0x38] sm:$0xff]   ;;  %v27_v20 = vld [vmem:[%s1158_s0 + $0x10] sm:$0xff]  ;;  %v30_v21 = vld [vmem:[%s1158_s0 + $0x28] sm:$0xff] }
   0x8   :  { %701 = vmatprep.subr.bf16.mxu0 %v739_v4  ;;  %204 = vmatprep.mubr.bf16.mxu0 %v34_v13  ;;  %v32_v22 = vld [vmem:[%s1158_s0 + $0x38] sm:$0xff] }
   0x9   :  { %541 = vmatprep.mubr.bf16.mxu1 %v34_v13 }
   0xb   :  { %702 = vmatpush3.bf16.msra.mxu0 %v740_v5 }
   0xc   :  { %703 = vmatprep.subr.bf16.mxu0 %v741_v6 }
   0xf   :  { %704 = vmatpush3.bf16.msra.mxu0 %v742_v7 }
  0x10   :  { %705 = vmatprep.subr.bf16.mxu0 %v743_v8 }
  0x13   :  { %706 = vmatpush3.bf16.msra.mxu0 %v744_v9 }
  0x14   :  { %707 = vmatprep.subr.bf16.mxu0 %v745_v10 }
  0x17   :  { %708 = vmatpush3.bf16.msra.mxu0 %v746_v14 }
  0x18   :  { %709 = vmatprep.subr.bf16.mxu0 %v747_v15 }
  0x1b   :  { %710 = vmatpush3.bf16.msra.mxu0 %v748_v16 }
  0x1c   :  { %711 = vmatprep.subr.bf16.mxu0 %v749_v17 }
  0x1d   :  { %13 = vsyncpa [#allocation5], 0  ;;  %v978_v23 = vpack.c.bf16 %v27_v20, %v25_v19  ;;  %v980_v24 = vpack.c.bf16 %v32_v22, %v30_v21  ;;  %v29_v25 = vld [vmem:[%s1158_s0 + $0x20] sm:$0xff]  ;;  %v31_v26 = vld [vmem:[%s1158_s0 + $0x30] sm:$0xff]  ;;  %vm221_vm0 = vcmask 15360  }
  0x1e   :  { %v990_v27 = vpack.c.bf16 %v31_v26, %v29_v25  ;;  %v648_v30 = vld [vmem:[%s1160_s2] ss:$0 sm:$0xff]  ;;  %v751_v49 = vld [vmem:[%s1161_s3 + $0x4] ss:$8 sps:$4 sm:$0xff]   ;;  %v754_v51 = vld [vmem:[%s1161_s3 + $0x14] ss:$8 sps:$4 sm:$0xff]  }
  0x1f   :  { %712 = vmatpush3.bf16.msra.mxu0 %v750_v18  ;;  %v753_v50 = vld [vmem:[%s1161_s3] ss:$8 sps:$4 sm:$0xff]   ;;  %509 = vmatprep.subr.bf16.mxu1 %v751_v49  ;;  %v756_v52 = vld [vmem:[%s1161_s3 + $0x10] ss:$8 sps:$4 sm:$0xff]   ;;  %v757_v53 = vld [vmem:[%s1161_s3 + $0x24] ss:$8 sps:$4 sm:$0xff]  }
  0x20   :  { %510 = vmatpush1.bf16.msra.mxu1 %v753_v50  ;;  %v759_v54 = vld [vmem:[%s1161_s3 + $0x20] ss:$8 sps:$4 sm:$0xff]   ;;  %v760_v55 = vld [vmem:[%s1161_s3 + $0x34] ss:$8 sps:$4 sm:$0xff]   ;;  %v762_v56 = vld [vmem:[%s1161_s3 + $0x30] ss:$8 sps:$4 sm:$0xff]  }
  0x21   :  { %511 = vmatprep.subr.bf16.mxu1 %v754_v51  ;;  %v763_v57 = vld [vmem:[%s1161_s3 + $0x44] ss:$8 sps:$4 sm:$0xff]   ;;  %v765_v58 = vld [vmem:[%s1161_s3 + $0x40] ss:$8 sps:$4 sm:$0xff]   ;;  %v766_v59 = vld [vmem:[%s1161_s3 + $0x54] ss:$8 sps:$4 sm:$0xff]  }
  0x22   :  { %205 = vmatmul.mubr.bf16.vlgmr.msra.gmra.mrb[0].mxu0 %v978_v23  ;;  %v768_v60 = vld [vmem:[%s1161_s3 + $0x50] ss:$8 sps:$4 sm:$0xff]   ;;  %v769_v61 = vld [vmem:[%s1161_s3 + $0x64] ss:$8 sps:$4 sm:$0xff]   ;;  %v771_v62 = vld [vmem:[%s1161_s3 + $0x60] ss:$8 sps:$4 sm:$0xff]  }
  0x23   :  { %212 = vmatprep.mubr.bf16.mxu0 %v980_v24  ;;  %v772_v63 = vld [vmem:[%s1161_s3 + $0x74] ss:$8 sps:$4 sm:$0xff]   ;;  %v774_v0 = vld [vmem:[%s1161_s3 + $0x70] ss:$8 sps:$4 sm:$0xff]   ;;  %v775_v1 = vld [vmem:[%s1161_s3 + $0x84] ss:$8 sps:$4 sm:$0xff]  }
  0x24   :  { %512 = vmatpush1.bf16.msra.mxu1 %v756_v52  ;;  %v777_v2 = vld [vmem:[%s1161_s3 + $0x80] ss:$8 sps:$4 sm:$0xff]   ;;  %v778_v3 = vld [vmem:[%s1161_s3 + $0x94] ss:$8 sps:$4 sm:$0xff]   ;;  %v780_v4 = vld [vmem:[%s1161_s3 + $0x90] ss:$8 sps:$4 sm:$0xff]  }
  0x25   :  { %513 = vmatprep.subr.bf16.mxu1 %v757_v53  ;;  %v781_v5 = vld [vmem:[%s1161_s3 + $0xa4] ss:$8 sps:$4 sm:$0xff]   ;;  %v783_v6 = vld [vmem:[%s1161_s3 + $0xa0] ss:$8 sps:$4 sm:$0xff]   ;;  %v784_v7 = vld [vmem:[%s1161_s3 + $0xb4] ss:$8 sps:$4 sm:$0xff]  }
  0x26   :  { %v786_v8 = vld [vmem:[%s1161_s3 + $0xb0] ss:$8 sps:$4 sm:$0xff]   ;;  %v787_v9 = vld [vmem:[%s1161_s3 + $0xc4] ss:$8 sps:$4 sm:$0xff]   ;;  %v789_v10 = vld [vmem:[%s1161_s3 + $0xc0] ss:$8 sps:$4 sm:$0xff]  }
  0x27   :  { %v790_v11 = vld [vmem:[%s1161_s3 + $0xd4] ss:$8 sps:$4 sm:$0xff]   ;;  %v792_v12 = vld [vmem:[%s1161_s3 + $0xd0] ss:$8 sps:$4 sm:$0xff]   ;;  %v793_v13 = vld [vmem:[%s1161_s3 + $0xe4] ss:$8 sps:$4 sm:$0xff]  }
  0x28   :  { %514 = vmatpush1.bf16.msra.mxu1 %v759_v54  ;;  %v795_v14 = vld [vmem:[%s1161_s3 + $0xe0] ss:$8 sps:$4 sm:$0xff]   ;;  %v796_v15 = vld [vmem:[%s1161_s3 + $0xf4] ss:$8 sps:$4 sm:$0xff]   ;;  %v798_v16 = vld [vmem:[%s1161_s3 + $0xf0] ss:$8 sps:$4 sm:$0xff]  }
  0x29   :  { %515 = vmatprep.subr.bf16.mxu1 %v760_v55 }
  0x2a   :  { %213 = vmatmul.mubr.bf16.gmra.mrb[4].mxu0 %v990_v27 }
  0x2c   :  { %516 = vmatpush1.bf16.msra.mxu1 %v762_v56 }
  0x2d   :  { %517 = vmatprep.subr.bf16.mxu1 %v763_v57 }
  0x30   :  { %518 = vmatpush1.bf16.msra.mxu1 %v765_v58 }
  0x31   :  { %519 = vmatprep.subr.bf16.mxu1 %v766_v59 }
  0x34   :  { %520 = vmatpush1.bf16.msra.mxu1 %v768_v60 }
  0x35   :  { %521 = vmatprep.subr.bf16.mxu1 %v769_v61 }
  0x38   :  { %522 = vmatpush1.bf16.msra.mxu1 %v771_v62 }
  0x39   :  { %523 = vmatprep.subr.bf16.mxu1 %v772_v63  ;;  %v872_v63 = vmov 1  }
  0x3c   :  { %524 = vmatpush1.bf16.msra.mxu1 %v774_v0 }
  0x3d   :  { %525 = vmatprep.subr.bf16.mxu1 %v775_v1 }
  0x40   :  { %526 = vmatpush1.bf16.msra.mxu1 %v777_v2 }
  0x41   :  { %527 = vmatprep.subr.bf16.mxu1 %v778_v3 }
  0x44   :  { %528 = vmatpush1.bf16.msra.mxu1 %v780_v4  ;;  %v339_v4 = vlaneseq }
  0x45   :  { %529 = vmatprep.subr.bf16.mxu1 %v781_v5 }
  0x48   :  { %530 = vmatpush1.bf16.msra.mxu1 %v783_v6 }
  0x49   :  { %531 = vmatprep.subr.bf16.mxu1 %v784_v7 }
  0x4c   :  { %532 = vmatpush1.bf16.msra.mxu1 %v786_v8  ;;  %v340_v8 = vshrl.u32 %v339_v4, 7 }
  0x4d   :  { %533 = vmatprep.subr.bf16.mxu1 %v787_v9 }
  0x50   :  { %534 = vmatpush1.bf16.msra.mxu1 %v789_v10 }
  0x51   :  { %535 = vmatprep.subr.bf16.mxu1 %v790_v11 }
  0x54   :  { %536 = vmatpush1.bf16.msra.mxu1 %v792_v12 }
  0x55   :  { %537 = vmatprep.subr.bf16.mxu1 %v793_v13  ;;  %v341_v13 = vsub.s32 0, %v340_v8 }
  0x58   :  { %538 = vmatpush1.bf16.msra.mxu1 %v795_v14 }
  0x59   :  { %539 = vmatprep.subr.bf16.mxu1 %v796_v15  ;;  %v337_v15 = vld [vmem:[%s1162_s4] sm:$0x3]  ;;  %s873_s4 = smov [#allocation2]  }
  0x5a   :  { %s623_s7 = sshll.u32 %s873_s4, 4  ;;  %s624_s7 = int_to_ptr.vmem [resolvable:$true] %s623_s7 }
  0x5b   :  { %s823_s8 = scalar_lea.vmem %s624_s7, 512  ;;  %p828_p1 = scmp.lt.s32.totalorder %s624_s7, %s624_s7 }
  0x5c   :  { %540 = vmatpush1.bf16.msra.mxu1 %v798_v16  ;;  %p824_p0 = scmp.ne.s32.totalorder %s624_s7, %s823_s8  ;;  %p829_p2 = scmp.lt.s32.totalorder %s823_s8, %s823_s8 }
  0x5e   :  { %p830_p3 = por %p829_p2, %p828_p1 }
  0x5f   :  { %542 = vmatmul.mubr.bf16.vlgmr.msra.gmra.mrb[0].mxu1 %v978_v23 }
  0x60   :  { %551 = vmatprep.mubr.bf16.mxu1 %v980_v24  ;;  %p831_p4 = pnand %p830_p3, %p824_p0 }
  0x67   :  { %552 = vmatmul.mubr.bf16.gmra.mrb[4].mxu1 %v990_v27 }
  0xf5   :  { %v713_v28 = vpop.f32.mrb[0].mxu0 }
  0xf6   :  { %v714_v29 = vpop.f32.mrb[1].mxu0 }
  0xf7   :  { %v715_v31 = vadd.f32 %v714_v29, %v713_v28  ;;  %v716_v32 = vpop.f32.mrb[2].mxu0 }
  0xf8   :  { %v717_v33 = vpop.f32.mrb[3].mxu0 }
  0xf9   :  { %v718_v34 = vadd.f32 %v717_v33, %v716_v32  ;;  %v996_v35 = vadd.f32 %v715_v31, %v648_v30 }
  0xfb   :  { %v222_v36 = vsel %vm221_vm0, %v996_v35, -inf  ;;  %v1000_v37 = vadd.f32 %v718_v34, %v648_v30 }
  0xfc   :  { %223 = vmax.xlane.f32.xlu0 %v222_v36 }
  0xfd   :  { %v719_v38 = vpop.f32.mrb[4].mxu0  ;;  %v225_v41 = vsel %vm221_vm0, %v1000_v37, -inf }
  0xfe   :  { %v720_v39 = vpop.f32.mrb[5].mxu0 }
  0xff   :  { %v721_v40 = vadd.f32 %v720_v39, %v719_v38  ;;  %v722_v42 = vpop.f32.mrb[6].mxu0 }
 0x100   :  { %226 = vmax.xlane.f32.xlu0 %v225_v41  ;;  %v723_v43 = vpop.f32.mrb[7].mxu0 }
 0x101   :  { %v724_v44 = vadd.f32 %v723_v43, %v722_v42  ;;  %v1004_v45 = vadd.f32 %v721_v40, %v648_v30 }
 0x103   :  { %v228_v46 = vsel %vm221_vm0, %v1004_v45, -inf  ;;  %v1008_v47 = vadd.f32 %v724_v44, %v648_v30 }
 0x104   :  { %229 = vmax.xlane.f32.xlu1 %v228_v46 }
 0x105   :  { %v231_v48 = vsel %vm221_vm0, %v1008_v47, -inf }
 0x108   :  { %232 = vmax.xlane.f32.xlu1 %v231_v48 }
 0x132   :  { %v543_v54 = vpop.f32.mrb[0].mxu1 }
 0x133   :  { %v545_v55 = vpop.f32.mrb[1].mxu1 }
 0x134   :  { %v547_v56 = vpop.f32.mrb[2].mxu1 }
 0x135   :  { %v549_v57 = vpop.f32.mrb[3].mxu1 }
 0x13a   :  { %v553_v59 = vpop.f32.mrb[4].mxu1 }
 0x13b   :  { %v555_v60 = vpop.f32.mrb[5].mxu1 }
 0x13c   :  { %v557_v62 = vpop.f32.mrb[6].mxu1 }
 0x13d   :  { %v559_v2 = vpop.f32.mrb[7].mxu1 }
 0x189   :  { %v224_v17 = vpop.xlane.xlu0 %223 }
 0x18a   :  { %v234_v18 = vsub.f32 %v996_v35, %v224_v17  ;;  %v345_v17 = vsub.s32 1, %v340_v8 }
 0x18c   :  { %v238_v19 = vmul.f32 1.442695, %v234_v18 }
 0x18d   :  { %v227_v20 = vpop.xlane.xlu0 %226 }
 0x18e   :  { %799 = vpow2.f32 %v238_v19  ;;  %v235_v21 = vsub.f32 %v1000_v37, %v227_v20  ;;  %v871_v37 = vmov 0   ;;  %v346_v20 = vrot.slane %v337_v15, %v345_v17 }
 0x18f   :  { %732 = vset.pattern.permute.xlu1 %v871_v37  ;;  %731 = vset.pattern.permute.xlu0 %v871_v37 }
 0x190   :  { %v240_v22 = vmul.f32 1.442695, %v235_v21  ;;  %v556_v37 = vadd.f32 %v555_v60, %v346_v20 }
 0x191   :  { %v230_v25 = vpop.xlane.xlu1 %229 }
 0x192   :  { %801 = vpow2.f32 %v240_v22  ;;  %v236_v26 = vsub.f32 %v1004_v45, %v230_v25 }
 0x194   :  { %v242_v28 = vmul.f32 1.442695, %v236_v26 }
 0x195   :  { %v233_v29 = vpop.xlane.xlu1 %232 }
 0x196   :  { %803 = vpow2.f32 %v242_v28  ;;  %v237_v23 = vsub.f32 %v1008_v47, %v233_v29  ;;  %v546_v28 = vadd.f32 %v545_v55, %v346_v20 }
 0x198   :  { %v800_v24 = vpop.eup %799  ;;  %v244_v27 = vmul.f32 1.442695, %v237_v23 }
 0x199   :  { %v246_v30 = vsel %vm221_vm0, %v800_v24, 0.0 }
 0x19a   :  { %805 = vpow2.f32 %v244_v27  ;;  %247 = vadd.xlane.f32.xlu0 %v246_v30  ;;  %v550_v30 = vadd.f32 %v549_v57, %v346_v20 }
 0x19c   :  { %v802_v31 = vpop.eup %801 }
 0x19d   :  { %v249_v32 = vsel %vm221_vm0, %v802_v31, 0.0 }
 0x19e   :  { %250 = vadd.xlane.f32.xlu1 %v249_v32 }
 0x1a0   :  { %v804_v33 = vpop.eup %803 }
 0x1a1   :  { %v252_v34 = vsel %vm221_vm0, %v804_v33, 0.0 }
 0x1a2   :  { %253 = vadd.xlane.f32.xlu0 %v252_v34 }
 0x1a4   :  { %v806_v35 = vpop.eup %805 }
 0x1a5   :  { %v255_v36 = vsel %vm221_vm0, %v806_v35, 0.0 }
 0x1a6   :  { %256 = vadd.xlane.f32.xlu1 %v255_v36 }
 0x227   :  { %v248_v38 = vpop.xlane.xlu0 %247 }
 0x228   :  { %807 = vrcp.f32 %v248_v38 }
 0x22b   :  { %v251_v39 = vpop.xlane.xlu1 %250 }
 0x22c   :  { %809 = vrcp.f32 %v251_v39 }
 0x22f   :  { %v1119_v40 = vpop.xlane.xlu0 %253 }
 0x230   :  { %811 = vrcp.f32 %v1119_v40 }
 0x232   :  { %v808_v41 = vpop.eup %807 }
 0x233   :  { %v262_v42 = vmul.f32 %v808_v41, %v800_v24  ;;  %v1125_v53 = vpop.xlane.xlu1 %256 }
 0x234   :  { %813 = vrcp.f32 %v1125_v53 }
 0x235   :  { %v274_v43 = vmul.f32 %v262_v42, %v234_v18  ;;  %815 = vlog2.f32 %v248_v38  ;;  %v342_v18 = vrot.slane %v337_v15, %v341_v13 }
 0x236   :  { %v810_v44 = vpop.eup %809  ;;  %817 = vlog2.f32 %v251_v39 }
 0x237   :  { %v278_v45 = vsel %vm221_vm0, %v274_v43, 0.0  ;;  %v263_v46 = vmul.f32 %v810_v44, %v802_v31  ;;  %v548_v27 = vadd.f32 %v547_v56, %v342_v18  ;;  %v554_v36 = vadd.f32 %v553_v59, %v342_v18 }
 0x238   :  { %279 = vadd.xlane.f32.xlu0 %v278_v45  ;;  %819 = vlog2.f32 %v1119_v40 }
 0x239   :  { %v275_v47 = vmul.f32 %v263_v46, %v235_v21  ;;  %v558_v21 = vadd.f32 %v557_v62, %v342_v18  ;;  %821 = vlog2.f32 %v1125_v53 }
 0x23a   :  { %v812_v48 = vpop.eup %811 }
 0x23b   :  { %v281_v49 = vsel %vm221_vm0, %v275_v47, 0.0  ;;  %v264_v50 = vmul.f32 %v812_v48, %v804_v33 }
 0x23c   :  { %282 = vadd.xlane.f32.xlu1 %v281_v49 }
 0x23d   :  { %v276_v51 = vmul.f32 %v264_v50, %v236_v26  ;;  %v544_v26 = vadd.f32 %v543_v54, %v342_v18  ;;  %v560_v54 = vadd.f32 %v559_v2, %v346_v20 }
 0x23e   :  { %v814_v58 = vpop.eup %813 }
 0x23f   :  { %v284_v52 = vsel %vm221_vm0, %v276_v51, 0.0  ;;  %v265_v61 = vmul.f32 %v814_v58, %v806_v35  ;;  %v816_v3 = vpop.eup %815 }
 0x240   :  { %285 = vadd.xlane.f32.xlu0 %v284_v52  ;;  %v818_v5 = vpop.eup %817  ;;  %v267_v7 = vmul.f32 0.6931472, %v816_v3 }
 0x241   :  { %v277_v0 = vmul.f32 %v265_v61, %v237_v23  ;;  %v269_v9 = vmul.f32 0.6931472, %v818_v5 }
 0x242   :  { %v820_v45 = vpop.eup %819 }
 0x243   :  { %v287_v1 = vsel %vm221_vm0, %v277_v0, 0.0  ;;  %v822_v47 = vpop.eup %821 }
 0x244   :  { %v273_v49 = vmul.f32 0.6931472, %v822_v47 }
 0x24d   :  { %569 = vperm.xlu1 %732, %v263_v46  }
 0x251   :  { %574 = vperm.xlu1 %732, %v264_v50  }
 0x255   :  { %579 = vperm.xlu1 %732, %v265_v61  }
 0x256   :  { %564 = vperm.xlu0 %731, %v262_v42  }
 0x259   :  { %733 = vset.pattern.permute.xlu1 %v872_v63 }
 0x25a   :  { %591 = vperm.xlu1 %733, %v262_v42   ;;  %734 = vset.pattern.permute.xlu0 %v872_v63 }
 0x25e   :  { %595 = vperm.xlu1 %733, %v263_v46   ;;  %v271_v46 = vmul.f32 0.6931472, %v820_v45 }
 0x262   :  { %599 = vperm.xlu1 %733, %v264_v50  }
 0x286   :  { %288 = vadd.xlane.f32.xlu1 %v287_v1 }
 0x297   :  { %603 = vperm.xlu1 %733, %v265_v61  }
 0x2c5   :  { %v280_v6 = vpop.xlane.xlu0 %279 }
 0x2c6   :  { %v290_v11 = vsub.f32 %v267_v7, %v280_v6 }
 0x2c9   :  { %v283_v10 = vpop.xlane.xlu1 %282 }
 0x2ca   :  { %v291_v12 = vsub.f32 %v269_v9, %v283_v10 }
 0x2cc   :  { %v294_v14 = vadd.f32 %v291_v12, %v290_v11 }
 0x2cd   :  { %v570_v16 = vpop.permute.xlu1 %569  ;;  %v286_v22 = vpop.xlane.xlu0 %285 }
 0x2ce   :  { %v583_v35 = vmul.f32 %v570_v16, %v548_v27  ;;  %v292_v48 = vsub.f32 %v271_v46, %v286_v22 }
 0x2d0   :  { %v295_v51 = vadd.f32 %v294_v14, %v292_v48 }
 0x2d1   :  { %v575_v19 = vpop.permute.xlu1 %574 }
 0x2d2   :  { %v584_v42 = vmul.f32 %v575_v19, %v554_v36 }
 0x2d5   :  { %v580_v25 = vpop.permute.xlu1 %579  ;;  %v565_v23 = vpop.permute.xlu0 %564 }
 0x2d6   :  { %v585_v29 = vmul.f32 %v580_v25, %v558_v21  ;;  %v582_v31 = vmul.f32 %v565_v23, %v544_v26 }
 0x2d9   :  { %v592_v24 = vpop.permute.xlu1 %591 }
 0x2da   :  { %v606_v32 = vmul.f32 %v592_v24, %v546_v28 }
 0x2dc   :  { %v610_v33 = vadd.f32 %v606_v32, %v582_v31 }
 0x2dd   :  { %v596_v34 = vpop.permute.xlu1 %595 }
 0x2de   :  { %614 = vst [vmem:[#allocation2] sm:$0xff] %v610_v33  ;;  %v607_v38 = vmul.f32 %v596_v34, %v550_v30 }
 0x2e0   :  { %v611_v39 = vadd.f32 %v607_v38, %v583_v35 }
 0x2e1   :  { %v600_v41 = vpop.permute.xlu1 %599 }
 0x2e2   :  { %615 = vst [vmem:[#allocation2 + $0x8] sm:$0xff] %v611_v39  ;;  %v608_v43 = vmul.f32 %v600_v41, %v556_v37 }
 0x2e4   :  { %v612_v44 = vadd.f32 %v608_v43, %v584_v42 }
 0x2e6   :  { %616 = vst [vmem:[#allocation2 + $0x10] sm:$0xff] %v612_v44 }
 0x313   :  { %v289_v50 = vpop.xlane.xlu1 %288 }
 0x314   :  { %v293_v52 = vsub.f32 %v273_v49, %v289_v50 }
 0x316   :  { %v296_v55 = vadd.f32 %v295_v51, %v293_v52 }
 0x317   :  { %v604_v56 = vpop.permute.xlu1 %603 }
 0x318   :  { %v297_v57 = vrot.slane %v296_v55, 4  ;;  %v609_v58 = vmul.f32 %v604_v56, %v560_v54 }
 0x31a   :  { %v298_v59 = vadd.f32 %v297_v57, %v296_v55  ;;  %v613_v60 = vadd.f32 %v609_v58, %v585_v29 }
 0x31c   :  { %v299_v40 = vrot.slane %v298_v59, 2  ;;  %617 = vst [vmem:[#allocation2 + $0x18] sm:$0xff] %v613_v60 }
 0x31d   :  { %834 = shalt.err (!%p831_p4)
}
 0x31e   :  { %s835_s11 = scalar_lea.hbm %s1163_s5, 512 }
 0x31f   :  { %p836_p5 = scmp.ne.s32.totalorder %s1163_s5, %s835_s11  ;;  %p839_p6 = scmp.lt.u32.totalorder %s835_s11, %s1163_s5 }
 0x321   :  { %p841_p7 = pnand %p839_p6, %p836_p5 }
 0x323   :  { %844 = shalt.err (!%p841_p7)
}
 0x324   :  { %s874_s16 = smov 128   ;;  %s875_s1 = smov 8   ;;  %v300_v53 = vadd.f32 %v299_v40, %v298_v59  ;;  %vm303_vm1 = vcmask 0  }
 0x325   :  { %629 = dma.vmem_to_hbm [thread:$0]  %s624_s7, 512, %s1163_s5, [#allocation3], %s874_s16, %s874_s16, %s875_s1  }
 0x326   :  { %s876_s19 = smov [#allocation4]   ;;  %v301_v61 = vrot.slane %v300_v53, 1 }
 0x327   :  { %s636_s20 = sshll.u32 %s876_s19, 4  ;;  %s637_s20 = int_to_ptr.vmem [resolvable:$true] %s636_s20 }
 0x328   :  { %v302_v62 = vadd.f32 %v301_v61, %v300_v53  ;;  %s845_s21 = scalar_lea.vmem %s637_s20, 16  ;;  %s849_s0 = scalar_lea.vmem %s637_s20, 32 }
 0x329   :  { %p846_p8 = scmp.ne.s32.totalorder %s637_s20, %s845_s21  ;;  %p850_p9 = scmp.lt.s32.totalorder %s637_s20, %s637_s20 }
 0x32a   :  { %304 = vst.msk [vmem:[#allocation4] sm:$0x1] %vm303_vm1, %v302_v62  ;;  %p851_p10 = scmp.lt.s32.totalorder %s849_s0, %s845_s21 }
 0x32c   :  { %p852_p11 = por %p851_p10, %p850_p9 }
 0x32e   :  { %p853_p12 = pnand %p852_p11, %p846_p8 }
 0x330   :  { %856 = shalt.err (!%p853_p12)
}
 0x331   :  { %s857_s5 = scalar_lea.hbm %s1164_s6, 16 }
 0x332   :  { %p858_p13 = scmp.ne.s32.totalorder %s1164_s6, %s857_s5  ;;  %p861_p0 = scmp.lt.u32.totalorder %s857_s5, %s1164_s6 }
 0x334   :  { %p863_p1 = pnand %p861_p0, %p858_p13 }
 0x336   :  { %866 = shalt.err (!%p863_p1)
}
 0x337   :  { %639 = dma.vmem_to_hbm [thread:$0]  %s637_s20, 16, %s1164_s6, [#allocation5]  }
 0x338   :  { %867 = dma.done.wait [#allocation3], 512  }
 0x339   :  { %868 = vsyncadd [#allocation3], 4294966784 }
 0x33a   :  { %869 = dma.done.wait [#allocation5], 16  }
 0x33b   :  { %870 = vsyncadd [#allocation5], 4294967280 }
 0x33c   :  { %646 = vsyncpa [#allocation3], 1 }
 0x33d   :  { %647 = vsyncpa [#allocation5], 1 }

</bundles_post_ra>
